<compile_context>
chip_gen: v7x
topology: tpu7x:2x2x1
jax: 0.10.0
libtpu: 0.0.40
codegen_flags: <defaults>
</compile_context>

<pallas_src>
import jax
import jax.numpy as jnp
from jax.experimental import pallas as pl
from jax.experimental.pallas import tpu as pltpu

n_x = 5
n_h = 8
n_y = 4

TILE_B = 512  # batch rows per grid step (lane-dense, multiple of 128)


def mlp_kernel(xT_ref, w1_ref, b1_ref, w2_ref, b2_ref, oT_ref):
    # xT:(n_x,TILE_B)  w1:(n_h,n_x)  b1:(n_h,1)  w2:(n_y,n_h)  b2:(n_y,1)
    # hidden^T = tanh(W1 @ x^T + b1)        -> (n_h, TILE_B), lane-dense
    h = jnp.dot(w1_ref[...], xT_ref[...], preferred_element_type=jnp.float32)
    h = jnp.tanh(h + b1_ref[...])
    # y^T = W2 @ hidden^T + b2              -> (n_y, TILE_B), lane-dense store
    y = jnp.dot(w2_ref[...], h, preferred_element_type=jnp.float32) + b2_ref[...]
    oT_ref[...] = y.astype(oT_ref.dtype)


def mon_module_lineaire(x, w1, b1, w2, b2, *, tile_b=TILE_B):
    """Forward pass of MonModuleLineare.

    x:  (B, n_x)      -- same row-major layout as torch.nn.Linear input
    w1: (n_h, n_x), b1: (n_h,)   -- torch.nn.Linear (out, in) convention
    w2: (n_y, n_h), b2: (n_y,)
    returns (B, n_y)
    """
    B = x.shape[0]
    num_tiles = pl.cdiv(B, tile_b)
    B_pad = num_tiles * tile_b

    # Layout glue in plain JAX: batch -> lane axis, biases as column vectors.
    xT = jnp.transpose(x)                      # (n_x, B)
    if B_pad != B:
        xT = jnp.pad(xT, ((0, 0), (0, B_pad - B)))
    b1_col = b1.reshape(n_h, 1)
    b2_col = b2.reshape(n_y, 1)

    yT = pl.pallas_call(
        mlp_kernel,
        out_shape=jax.ShapeDtypeStruct((n_y, B_pad), x.dtype),
        grid=(num_tiles,),
        in_specs=[
            # x^T: one lane-dense batch tile per grid step.
            pl.BlockSpec((n_x, tile_b), lambda i: (0, i)),
            # Weights / biases: constant index_map -> fetched once, stay resident.
            pl.BlockSpec((n_h, n_x), lambda i: (0, 0)),
            pl.BlockSpec((n_h, 1), lambda i: (0, 0)),
            pl.BlockSpec((n_y, n_h), lambda i: (0, 0)),
            pl.BlockSpec((n_y, 1), lambda i: (0, 0)),
        ],
        out_specs=pl.BlockSpec((n_y, tile_b), lambda i: (0, i)),
        compiler_params=pltpu.CompilerParams(
            dimension_semantics=("parallel",),  # shard batch tiles across TCs (v7x)
        ),
    )(xT, w1, b1_col, w2, b2_col)

    # Drop batch padding and return to (B, n_y) row-major.
    return jnp.transpose(yT[:, :B])


if __name__ == "__main__":
    key = jax.random.PRNGKey(0)
    k_x, k_w1, k_b1, k_w2, k_b2 = jax.random.split(key, 5)

    batch = 8
    x = jax.random.normal(k_x, (batch, n_x), dtype=jnp.float32)

    # Deterministic parameter init (torch.nn.Linear-style uniform bounds).
    bound1 = 1.0 / (n_x ** 0.5)
    w1 = jax.random.uniform(k_w1, (n_h, n_x), jnp.float32, -bound1, bound1)
    b1 = jax.random.uniform(k_b1, (n_h,), jnp.float32, -bound1, bound1)
    bound2 = 1.0 / (n_h ** 0.5)
    w2 = jax.random.uniform(k_w2, (n_y, n_h), jnp.float32, -bound2, bound2)
    b2 = jax.random.uniform(k_b2, (n_y,), jnp.float32, -bound2, bound2)

    out = mon_module_lineaire(x, w1, b1, w2, b2)
    jax.block_until_ready(out)

    # Pure-JAX reference of the same forward pass.
    ref = jnp.tanh(x @ w1.T + b1) @ w2.T + b2
    assert out.shape == (batch, n_y)
    assert jnp.allclose(out, ref, atol=1e-5, rtol=1e-5)

    print("KERNEL_OK")
</pallas_src>

<mosaic_0001>
module attributes {stable_mosaic.version = 11 : i64} {
  func.func @mlp_kernel(%arg0: i32, %arg1: memref<5x512xf32, #tpu.memory_space<vmem>>, %arg2: memref<8x5xf32, #tpu.memory_space<vmem>>, %arg3: memref<8x1xf32, #tpu.memory_space<vmem>>, %arg4: memref<4x8xf32, #tpu.memory_space<vmem>>, %arg5: memref<4x1xf32, #tpu.memory_space<vmem>>, %arg6: memref<4x512xf32, #tpu.memory_space<vmem>>) attributes {dimension_semantics = [#tpu.dimension_semantics<parallel>], iteration_bounds = array<i64: 1>, scalar_prefetch = 0 : i64, scratch_operands = 0 : i64, tpu.core_type = #tpu.core_type<tc>, window_params = [{transform_indices = @transform_0, window_bounds = array<i64: 5, 512>}, {pipeline_mode = #tpu.pipeline_mode<synchronous>, transform_indices = @transform_1, window_bounds = array<i64: 8, 5>}, {pipeline_mode = #tpu.pipeline_mode<synchronous>, transform_indices = @transform_2, window_bounds = array<i64: 8, 1>}, {pipeline_mode = #tpu.pipeline_mode<synchronous>, transform_indices = @transform_3, window_bounds = array<i64: 4, 8>}, {pipeline_mode = #tpu.pipeline_mode<synchronous>, transform_indices = @transform_4, window_bounds = array<i64: 4, 1>}, {transform_indices = @transform_5, window_bounds = array<i64: 4, 512>}]} {
    %c0 = arith.constant 0 : index
    %c0_0 = arith.constant 0 : index
    %0 = vector.load %arg2[%c0, %c0_0] : memref<8x5xf32, #tpu.memory_space<vmem>>, vector<8x5xf32>
    %c0_1 = arith.constant 0 : index
    %c0_2 = arith.constant 0 : index
    %1 = vector.load %arg1[%c0_1, %c0_2] : memref<5x512xf32, #tpu.memory_space<vmem>>, vector<5x512xf32>
    %cst = arith.constant dense<0.000000e+00> : vector<8x512xf32>
    %2 = tpu.matmul %0, %1, %cst {dimension_numbers = #tpu.dot_dimension_numbers<[1], [0], [0], [1], [0, 0, 1, 1], [], []>} : vector<8x5xf32>, vector<5x512xf32>, vector<8x512xf32> -> vector<8x512xf32>
    %c0_3 = arith.constant 0 : index
    %c0_4 = arith.constant 0 : index
    %3 = vector.load %arg3[%c0_3, %c0_4] : memref<8x1xf32, #tpu.memory_space<vmem>>, vector<8x1xf32>
    %4 = vector.broadcast %3 : vector<8x1xf32> to vector<8x512xf32>
    %5 = arith.addf %2, %4 : vector<8x512xf32>
    %6 = math.tanh %5 : vector<8x512xf32>
    %c0_5 = arith.constant 0 : index
    %c0_6 = arith.constant 0 : index
    %7 = vector.load %arg4[%c0_5, %c0_6] : memref<4x8xf32, #tpu.memory_space<vmem>>, vector<4x8xf32>
    %cst_7 = arith.constant dense<0.000000e+00> : vector<4x512xf32>
    %8 = tpu.matmul %7, %6, %cst_7 {dimension_numbers = #tpu.dot_dimension_numbers<[1], [0], [0], [1], [0, 0, 1, 1], [], []>} : vector<4x8xf32>, vector<8x512xf32>, vector<4x512xf32> -> vector<4x512xf32>
    %c0_8 = arith.constant 0 : index
    %c0_9 = arith.constant 0 : index
    %9 = vector.load %arg5[%c0_8, %c0_9] : memref<4x1xf32, #tpu.memory_space<vmem>>, vector<4x1xf32>
    %10 = vector.broadcast %9 : vector<4x1xf32> to vector<4x512xf32>
    %11 = arith.addf %8, %10 : vector<4x512xf32>
    %c0_10 = arith.constant 0 : index
    %c0_11 = arith.constant 0 : index
    %12 = vector.load %arg6[%c0_10, %c0_11] : memref<4x512xf32, #tpu.memory_space<vmem>>, vector<4x512xf32>
    tpu.vector_store %arg6[%c0_10, %c0_11], %11 {strides = array<i32>} : memref<4x512xf32, #tpu.memory_space<vmem>>, vector<4x512xf32>,
    return
  }
  func.func @transform_0(%arg0: i32) -> (i32, i32) {
    %c0_i32 = arith.constant 0 : i32
    %c0_i32_0 = arith.constant 0 : i32
    return %c0_i32, %arg0 : i32, i32
  }
  func.func @transform_1(%arg0: i32) -> (i32, i32) {
    %c0_i32 = arith.constant 0 : i32
    %c0_i32_0 = arith.constant 0 : i32
    %c0_i32_1 = arith.constant 0 : i32
    return %c0_i32, %c0_i32_0 : i32, i32
  }
  func.func @transform_2(%arg0: i32) -> (i32, i32) {
    %c0_i32 = arith.constant 0 : i32
    %c0_i32_0 = arith.constant 0 : i32
    %c0_i32_1 = arith.constant 0 : i32
    return %c0_i32, %c0_i32_0 : i32, i32
  }
  func.func @transform_3(%arg0: i32) -> (i32, i32) {
    %c0_i32 = arith.constant 0 : i32
    %c0_i32_0 = arith.constant 0 : i32
    %c0_i32_1 = arith.constant 0 : i32
    return %c0_i32, %c0_i32_0 : i32, i32
  }
  func.func @transform_4(%arg0: i32) -> (i32, i32) {
    %c0_i32 = arith.constant 0 : i32
    %c0_i32_0 = arith.constant 0 : i32
    %c0_i32_1 = arith.constant 0 : i32
    return %c0_i32, %c0_i32_0 : i32, i32
  }
  func.func @transform_5(%arg0: i32) -> (i32, i32) {
    %c0_i32 = arith.constant 0 : i32
    %c0_i32_0 = arith.constant 0 : i32
    return %c0_i32, %arg0 : i32, i32
  }
}

</mosaic_0001>

<bundles_post_ra>
// kernel: tpu_custom_call.1
= control target key start
LH: loop header
LB: loop body
LE: loop exit
PB: predicated region body
PF: predicated region fallthrough
CT: control target
= control target key end

     0   :  { %10 = vsyncpa [#allocation3], 0  ;;  %s524_s0 = inlined_call_operand.hbm [shape: f32[5,512], index: 0, kind: input, shape index: {}]   ;;  %s525_s1 = inlined_call_operand.vmem [shape: f32[8,5], index: 1, kind: input, shape index: {}]   ;;  %s526_s2 = inlined_call_operand.vmem [shape: f32[8,1], index: 2, kind: input, shape index: {}]   ;;  %s527_s3 = inlined_call_operand.vmem [shape: f32[4,8], index: 3, kind: input, shape index: {}]   ;;  %s528_s4 = inlined_call_operand.vmem [shape: f32[4,1], index: 4, kind: input, shape index: {}]   ;;  %s529_s5 = inlined_call_operand.hbm [shape: f32[4,512], index: 5, kind: output, shape index: {}]  }
   0x1   :  { %11 = vsyncpa [#allocation4], 0  ;;  %s454_s18 = smov [#allocation2]   ;;  %s406_s22 = scalar_lea.hbm %s524_s0, 512 }
   0x2   :  { %s18_s19 = sshll.u32 %s454_s18, 4  ;;  %p407_p0 = scmp.ne.s32.totalorder %s524_s0, %s406_s22  ;;  %s19_s19 = int_to_ptr.vmem [resolvable:$true] %s18_s19 }
   0x3   :  { %p410_p1 = scmp.lt.u32.totalorder %s406_s22, %s524_s0 }
   0x5   :  { %p412_p2 = pnand %p410_p1, %p407_p0 }
   0x7   :  { %415 = shalt.err (!%p412_p2)
}
   0x8   :  { %s416_s27 = scalar_lea.vmem %s19_s19, 512  ;;  %p421_p4 = scmp.lt.s32.totalorder %s19_s19, %s19_s19 }
   0x9   :  { %p417_p3 = scmp.ne.s32.totalorder %s19_s19, %s416_s27  ;;  %p422_p5 = scmp.lt.s32.totalorder %s416_s27, %s416_s27 }
   0xb   :  { %p423_p6 = por %p422_p5, %p421_p4 }
   0xd   :  { %p424_p7 = pnand %p423_p6, %p417_p3 }
   0xf   :  { %427 = shalt.err (!%p424_p7)
}
  0x10   :  { %21 = dma.hbm_to_vmem [thread:$0]  %s524_s0, 512, %s19_s19, [#allocation3]  }
  0x11   :  { %450 = dma.done.wait [#allocation3], 512  }
  0x12   :  { %451 = vsyncadd [#allocation3], 4294966784  ;;  %v455_v0 = vmov 0.0   ;;  %v456_v1 = vmov 0   ;;  %vm48_vm0 = vcmask 1044480   ;;  %vm44_vm1 = vcmask 39936  }
  0x13   :  { %125 = vmatprep.mubr.f32.mxu0 %v455_v0  ;;  %196 = vmatprep.mubr.f32.mxu1 %v455_v0  ;;  %v35_v2 = vld [vmem:[#allocation2 + $0x8] sm:$0x1f]  ;;  %v37_v3 = vld [vmem:[#allocation2 + $0x18] sm:$0x1f]  ;;  %v34_v4 = vld [vmem:[#allocation2] sm:$0x1f] }
  0x14   :  { %397 = vset.pattern.permute.xlu0 %v456_v1  ;;  %385 = vmatprep.subr.msk.mxu0 %vm48_vm0, %v35_v2  ;;  %v36_v5 = vld [vmem:[#allocation2 + $0x10] sm:$0x1f]  ;;  %v33_v6 = vld [vmem:[%s525_s1] sm:$0xff]  ;;  %vm214_vm2 = vcmask 64512  }
  0x15   :  { %388 = vmatprep.subr.msk.mxu1 %vm48_vm0, %v37_v3  ;;  %v38_v7 = vld [vmem:[%s526_s2] sm:$0xff]  ;;  %386 = vmatpush1.msk.msra.mxu0 %vm48_vm0, %v34_v4 }
  0x16   :  { %389 = vmatpush1.msk.msra.mxu1 %vm48_vm0, %v36_v5  ;;  %387 = vmatmul.mubr.msk.f32.vlgmr.msra.gmra.mrb[0].mxu0 %vm44_vm1, %v33_v6  ;;  %v208_v8 = vld [vmem:[%s528_s4] sm:$0xf]  ;;  %s457_s4 = smov [#allocation5]  }
  0x17   :  { %390 = vmatmul.mubr.msk.f32.vlgmr.msra.gmra.mrb[0].mxu1 %vm44_vm1, %v33_v6  ;;  %41 = vperm.xlu0 %397, %v38_v7   ;;  %v207_v20 = vld [vmem:[%s527_s3] sm:$0xf]  ;;  %s376_s10 = sshll.u32 %s457_s4, 4  ;;  %s377_s10 = int_to_ptr.vmem [resolvable:$true] %s376_s10 }
  0x18   :  { %282 = vmatprep.mubr.f32.mxu0 %v455_v0  ;;  %353 = vmatprep.mubr.f32.mxu1 %v455_v0  ;;  %s428_s3 = scalar_lea.vmem %s377_s10, 256  ;;  %p433_p9 = scmp.lt.s32.totalorder %s377_s10, %s377_s10 }
  0x19   :  { %p429_p8 = scmp.ne.s32.totalorder %s377_s10, %s428_s3  ;;  %p434_p10 = scmp.lt.s32.totalorder %s428_s3, %s428_s3 }
  0x1b   :  { %211 = vperm.xlu0 %397, %v208_v8   ;;  %p435_p11 = por %p434_p10, %p433_p9 }
  0x1d   :  { %p436_p12 = pnand %p435_p11, %p429_p8 }
  0x96   :  { %v42_v9 = vpop.permute.xlu0 %41 }
  0x9a   :  { %v212_v23 = vpop.permute.xlu0 %211 }
  0xe9   :  { %v127_v10 = vpop.f32.mrb[0].mxu0 }
  0xea   :  { %v198_v11 = vpop.f32.mrb[0].mxu1  ;;  %v128_v12 = vadd.f32 %v127_v10, %v42_v9  ;;  %v129_v13 = vpop.f32.mrb[1].mxu0 }
  0xeb   :  { %v200_v14 = vpop.f32.mrb[1].mxu1  ;;  %v130_v15 = vadd.f32 %v129_v13, %v42_v9  ;;  %v199_v17 = vadd.f32 %v198_v11, %v42_v9 }
  0xec   :  { %v201_v16 = vadd.f32 %v200_v14, %v42_v9  ;;  %398 = vtanh.f32 %v128_v12 }
  0xed   :  { %400 = vtanh.f32 %v130_v15 }
  0xee   :  { %402 = vtanh.f32 %v201_v16 }
  0xef   :  { %404 = vtanh.f32 %v199_v17 }
  0xf6   :  { %v399_v18 = vpop.eup %398 }
  0xf7   :  { %v401_v19 = vpop.eup %400 }
  0xf8   :  { %v403_v21 = vpop.eup %402  ;;  %218 = vmatprep.subr.mxu0 %v401_v19 }
  0xf9   :  { %v405_v22 = vpop.eup %404  ;;  %289 = vmatprep.subr.mxu1 %v403_v21  ;;  %219 = vmatpush1.msra.mxu0 %v399_v18 }
  0xfa   :  { %290 = vmatpush1.msra.mxu1 %v405_v22  ;;  %391 = vmatmul.mubr.msk.f32.vlgmr.msra.gmra.mrb[2].mxu0 %vm214_vm2, %v207_v20 }
  0xfb   :  { %392 = vmatmul.mubr.msk.f32.vlgmr.msra.gmra.mrb[2].mxu1 %vm214_vm2, %v207_v20 }
 0x1cd   :  { %v284_v24 = vpop.f32.mrb[2].mxu0 }
 0x1ce   :  { %v285_v25 = vadd.f32 %v284_v24, %v212_v23  ;;  %v355_v26 = vpop.f32.mrb[2].mxu1  ;;  %v286_v27 = vpop.f32.mrb[3].mxu0 }
 0x1cf   :  { %v356_v28 = vadd.f32 %v355_v26, %v212_v23  ;;  %v287_v29 = vadd.f32 %v286_v27, %v212_v23  ;;  %v357_v30 = vpop.f32.mrb[3].mxu1 }
 0x1d0   :  { %v358_v31 = vadd.f32 %v357_v30, %v212_v23 }
 0x1d1   :  { %v364_v32 = vcombine.low %v285_v25, %v287_v29 }
 0x1d2   :  { %v365_v33 = vcombine.low %v356_v28, %v358_v31 }
 0x1d3   :  { %368 = vst [vmem:[#allocation5] sm:$0xff] %v364_v32 }
 0x1d4   :  { %369 = vst [vmem:[#allocation5 + $0x8] sm:$0xff] %v365_v33 }
 0x1d5   :  { %439 = shalt.err (!%p436_p12)
}
 0x1d6   :  { %s440_s13 = scalar_lea.hbm %s529_s5, 256 }
 0x1d7   :  { %p441_p13 = scmp.ne.s32.totalorder %s529_s5, %s440_s13  ;;  %p444_p0 = scmp.lt.u32.totalorder %s440_s13, %s529_s5 }
 0x1d9   :  { %p446_p1 = pnand %p444_p0, %p441_p13 }
 0x1db   :  { %449 = shalt.err (!%p446_p1)
}
 0x1dc   :  { %379 = dma.vmem_to_hbm [thread:$0]  %s377_s10, 256, %s529_s5, [#allocation4]  }
 0x1dd   :  { %452 = dma.done.wait [#allocation4], 256  }
 0x1de   :  { %453 = vsyncadd [#allocation4], 4294967040 }
 0x1df   :  { %383 = vsyncpa [#allocation3], 1 }
 0x1e0   :  { %384 = vsyncpa [#allocation4], 1 }

</bundles_post_ra>
